<compile_context>
chip_gen: v7x
topology: tpu7x:2x2x1
jax: 0.10.0
libtpu: 0.0.40
codegen_flags: <defaults>
</compile_context>

<pallas_src>
import functools

import jax
import jax.numpy as jnp
from jax.experimental import pallas as pl
from jax.experimental.pallas import tpu as pltpu


def _round_up(x, m):
    return ((x + m - 1) // m) * m


def _round_down(x, m):
    return (x // m) * m


def _sublane_pack(dtype):
    # Native sublane packing: 8 rows for 4-byte dtypes, 16 for 2-byte, 32 for 1-byte.
    return max(8, 32 // jnp.dtype(dtype).itemsize)


def _vmem_capacity_bytes():
    try:
        cap = int(pltpu.get_tpu_info().vmem_capacity_bytes)
        if cap > 0:
            return cap
    except Exception:
        pass
    # Conservative fallback: 64 MiB is the smallest physical VMEM across
    # supported generations (v7x); safe everywhere.
    return 64 * 1024 * 1024


def _num_tensorcores():
    """Best-effort TensorCore-per-chip count; default to 1 (safe direction)."""
    try:
        info = pltpu.get_tpu_info()
        for attr in ("num_cores", "core_count", "tensorcore_count", "num_tensorcores"):
            v = getattr(info, attr, None)
            if isinstance(v, int) and v > 0:
                return v
    except Exception:
        pass
    try:
        kind = jax.devices()[0].device_kind.lower()
        # v4 / v5p / v7x are 2-TC (megacore) parts; v5e / v6e are single-TC.
        if any(tag in kind for tag in ("v4", "v5p", "v7", "7x")):
            return 2
    except Exception:
        pass
    return 1


def _weight_spec(hidden):
    # Resident (1, H) weight row: constant index_map, so single-buffering is
    # enough. Fall back to the default spec if pipeline_mode is unavailable.
    try:
        return pl.BlockSpec((1, hidden), lambda i: (0, 0),
                            pipeline_mode=pl.Buffered(1))
    except Exception:
        return pl.BlockSpec((1, hidden), lambda i: (0, 0))


def _rmsnorm_kernel(x_ref, w_ref, o_ref, *, eps, input_dtype):
    # x_ref: (TM, H) tile of input rows; w_ref: (1, H) resident weight row.
    # NOTE: when rows % TM != 0 the tail block reduces over padded rows too;
    # that is benign (reduction is per-row, padded rows are never written back).
    x32 = x_ref[...].astype(jnp.float32)
    var = jnp.mean(x32 * x32, axis=-1, keepdims=True)        # (TM, 1) VPU/XLU reduce
    inv = jax.lax.rsqrt(var + eps)                           # EUP
    # Re-read x_ref so the full-tile f32 upcast need not stay live across the
    # reduction; cast BEFORE the weight multiply (reference semantics).
    normed = (x_ref[...].astype(jnp.float32) * inv).astype(input_dtype)
    o_ref[...] = (w_ref[...] * normed).astype(o_ref.dtype)


def qwen2_rmsnorm(hidden_states, weight, eps=1e-6, *, block_rows=None, out_dtype=None):
    """RMSNorm over the last axis of `hidden_states` (any leading dims).

    block_rows: optional explicit row-tile override (sublane-rounded).
    out_dtype:  optional output dtype override (default: PyTorch-style
                promotion of weight dtype and input dtype).
    """
    input_dtype = hidden_states.dtype
    orig_shape = hidden_states.shape
    hidden = orig_shape[-1]
    rows = 1
    for d in orig_shape[:-1]:
        rows *= d

    x2d = hidden_states.reshape(rows, hidden)
    w2d = weight.reshape(1, hidden)

    # Output dtype follows promotion of weight * normed (matches PyTorch),
    # unless explicitly overridden by the caller.
    if out_dtype is None:
        out_dtype = jnp.promote_types(weight.dtype, input_dtype)

    in_bytes = jnp.dtype(input_dtype).itemsize
    out_bytes = jnp.dtype(out_dtype).itemsize
    w_bytes = jnp.dtype(weight.dtype).itemsize
    sublane = _sublane_pack(input_dtype)

    # --- Tile-size selection (byte-targeted, VMEM-budget aware) -------------
    capacity = _vmem_capacity_bytes()
    small_vmem = capacity <= (64 << 20)
    budget = int(capacity * (0.6 if small_vmem else 0.75))

    # Per-row VMEM cost: double-buffered input + output pipeline buffers plus
    # the f32 working set of the upcast intermediates inside the kernel.
    weight_footprint = 2 * hidden * w_bytes
    per_row = hidden * (2 * in_bytes + 2 * out_bytes + 2 * 4)
    tm_vmem = (budget - weight_footprint - (2 << 20)) // max(per_row, 1)
    tm_vmem = max(sublane, _round_down(tm_vmem, sublane))

    if block_rows is None:
        # Size tiles by bytes: ~8 MiB per input buffer on 128 MiB chips,
        # ~4 MiB on 64 MiB chips (the HBM-roofline knee is ~4 MiB tiles).
        target_tile_bytes = (4 << 20) if small_vmem else (8 << 20)
        tm_target = max(sublane,
                        _round_down(target_tile_bytes // max(hidden * in_bytes, 1),
                                    sublane))
    else:
        tm_target = max(sublane, _round_up(int(block_rows), sublane))

    tm = min(
        tm_target,                                 # byte-targeted (or requested) rows
        tm_vmem,                                   # fits the VMEM budget
        _round_up(rows, sublane),                  # never bigger than the (padded) problem
    )

    # Megacore: only force extra grid steps on chips with >1 TensorCore
    # (v4/v5p/v7x). On single-TC v5e/v6e keep the single largest tile.
    num_tc = _num_tensorcores()
    if num_tc >= 2:
        min_steps = 2 * num_tc
        if rows >= min_steps * sublane and pl.cdiv(rows, tm) < min_steps:
            tm = max(sublane, _round_up(pl.cdiv(rows, min_steps), sublane))

    grid = (pl.cdiv(rows, tm),)

    # Explicit VMEM limit sized to the chosen tile (+ headroom), capped well
    # below physical capacity so Mosaic internal scratch always has room.
    footprint = (2 * tm * hidden * in_bytes            # input pipeline buffers
                 + 2 * tm * hidden * out_bytes         # output pipeline buffers
                 + 2 * tm * hidden * 4                 # f32 working set
                 + weight_footprint)
    hard_cap = max(16 << 20, min(int(capacity * 0.85), capacity - (8 << 20)))
    vmem_limit = int(min(hard_cap, max(footprint + (4 << 20), 16 << 20)))

    kernel = functools.partial(_rmsnorm_kernel, eps=eps, input_dtype=input_dtype)

    out2d = pl.pallas_call(
        kernel,
        out_shape=jax.ShapeDtypeStruct((rows, hidden), out_dtype),
        grid_spec=pltpu.PrefetchScalarGridSpec(
            num_scalar_prefetch=0,
            grid=grid,
            in_specs=[
                pl.BlockSpec((tm, hidden), lambda i: (i, 0)),
                _weight_spec(hidden),                  # resident weight row
            ],
            out_specs=pl.BlockSpec((tm, hidden), lambda i: (i, 0)),
        ),
        compiler_params=pltpu.CompilerParams(
            dimension_semantics=("parallel",),
            vmem_limit_bytes=vmem_limit,
        ),
    )(x2d, w2d)

    return out2d.reshape(orig_shape[:-1] + (hidden,))


def _reference(hidden_states, weight, eps=1e-6):
    input_dtype = hidden_states.dtype
    x32 = hidden_states.astype(jnp.float32)
    var = jnp.mean(x32 * x32, axis=-1, keepdims=True)
    normed = (x32 * jax.lax.rsqrt(var + eps)).astype(input_dtype)
    return weight * normed


if __name__ == "__main__":
    key = jax.random.PRNGKey(0)
    batch, seq, hidden = 2, 8, 32

    x = jax.random.normal(key, (batch, seq, hidden), dtype=jnp.float32)
    # Deterministic parameter init matching nn.Parameter(torch.ones(hidden_size)).
    weight = jnp.ones((hidden,), dtype=jnp.float32)
    eps = 1e-6

    out = qwen2_rmsnorm(x, weight, eps)
    out = jax.block_until_ready(out)

    ref = _reference(x, weight, eps)
    assert out.shape == x.shape, (out.shape, x.shape)
    assert out.dtype == ref.dtype, (out.dtype, ref.dtype)
    assert jnp.allclose(out, ref, atol=1e-5, rtol=1e-5), "mismatch vs reference"

    print("KERNEL_OK")
</pallas_src>

<mosaic_0001>
module attributes {stable_mosaic.version = 11 : i64} {
  func.func @_rmsnorm_kernel(%arg0: i32, %arg1: memref<16x32xf32, #tpu.memory_space<vmem>>, %arg2: memref<1x32xf32, #tpu.memory_space<vmem>>, %arg3: memref<16x32xf32, #tpu.memory_space<vmem>>) attributes {dimension_semantics = [#tpu.dimension_semantics<parallel>], iteration_bounds = array<i64: 1>, scalar_prefetch = 0 : i64, scratch_operands = 0 : i64, tpu.core_type = #tpu.core_type<tc>, window_params = [{transform_indices = @transform_0, window_bounds = array<i64: 16, 32>}, {pipeline_mode = #tpu.pipeline_mode<synchronous>, transform_indices = @transform_1, window_bounds = array<i64: 1, 32>}, {transform_indices = @transform_2, window_bounds = array<i64: 16, 32>}]} {
    %c0 = arith.constant 0 : index
    %c0_0 = arith.constant 0 : index
    %0 = vector.load %arg1[%c0, %c0_0] : memref<16x32xf32, #tpu.memory_space<vmem>>, vector<16x32xf32>
    %1 = arith.mulf %0, %0 : vector<16x32xf32>
    %cst = arith.constant dense<0.000000e+00> : vector<16xf32>
    %2 = vector.multi_reduction <add>, %1, %cst [1] : vector<16x32xf32> to vector<16xf32>
    %3 = vector.shape_cast %2 : vector<16xf32> to vector<16x1xf32>
    %cst_1 = arith.constant 3.200000e+01 : f32
    %4 = vector.broadcast %cst_1 : f32 to vector<16x1xf32>
    %5 = arith.divf %3, %4 : vector<16x1xf32>
    %cst_2 = arith.constant 9.99999997E-7 : f32
    %6 = vector.broadcast %cst_2 : f32 to vector<16x1xf32>
    %7 = arith.addf %5, %6 : vector<16x1xf32>
    %8 = math.rsqrt %7 : vector<16x1xf32>
    %c0_3 = arith.constant 0 : index
    %c0_4 = arith.constant 0 : index
    %9 = vector.load %arg1[%c0_3, %c0_4] : memref<16x32xf32, #tpu.memory_space<vmem>>, vector<16x32xf32>
    %10 = vector.broadcast %8 : vector<16x1xf32> to vector<16x32xf32>
    %11 = arith.mulf %9, %10 : vector<16x32xf32>
    %c0_5 = arith.constant 0 : index
    %c0_6 = arith.constant 0 : index
    %12 = vector.load %arg2[%c0_5, %c0_6] : memref<1x32xf32, #tpu.memory_space<vmem>>, vector<1x32xf32>
    %13 = vector.broadcast %12 : vector<1x32xf32> to vector<16x32xf32>
    %14 = arith.mulf %13, %11 : vector<16x32xf32>
    %c0_7 = arith.constant 0 : index
    %c0_8 = arith.constant 0 : index
    %15 = vector.load %arg3[%c0_7, %c0_8] : memref<16x32xf32, #tpu.memory_space<vmem>>, vector<16x32xf32>
    tpu.vector_store %arg3[%c0_7, %c0_8], %14 {strides = array<i32>} : memref<16x32xf32, #tpu.memory_space<vmem>>, vector<16x32xf32>,
    return
  }
  func.func @transform_0(%arg0: i32) -> (i32, i32) {
    %c0_i32 = arith.constant 0 : i32
    %c0_i32_0 = arith.constant 0 : i32
    return %arg0, %c0_i32 : i32, i32
  }
  func.func @transform_1(%arg0: i32) -> (i32, i32) {
    %c0_i32 = arith.constant 0 : i32
    %c0_i32_0 = arith.constant 0 : i32
    %c0_i32_1 = arith.constant 0 : i32
    return %c0_i32, %c0_i32_0 : i32, i32
  }
  func.func @transform_2(%arg0: i32) -> (i32, i32) {
    %c0_i32 = arith.constant 0 : i32
    %c0_i32_0 = arith.constant 0 : i32
    return %arg0, %c0_i32 : i32, i32
  }
}

</mosaic_0001>

<bundles_post_ra>
// kernel: tpu_custom_call.1
= control target key start
LH: loop header
LB: loop body
LE: loop exit
PB: predicated region body
PF: predicated region fallthrough
CT: control target
= control target key end

     0   :  { %7 = vsyncpa [#allocation3], 0  ;;  %s187_s0 = inlined_call_operand.hbm [shape: f32[16,32], index: 0, kind: input, shape index: {}]   ;;  %s188_s1 = inlined_call_operand.vmem [shape: f32[1,32], index: 1, kind: input, shape index: {}]   ;;  %s189_s2 = inlined_call_operand.hbm [shape: f32[16,32], index: 2, kind: output, shape index: {}]  }
   0x1   :  { %8 = vsyncpa [#allocation4], 0  ;;  %s131_s9 = smov [#allocation2]   ;;  %s83_s13 = scalar_lea.hbm %s187_s0, 256 }
   0x2   :  { %s14_s10 = sshll.u32 %s131_s9, 4  ;;  %p84_p0 = scmp.ne.s32.totalorder %s187_s0, %s83_s13  ;;  %s15_s10 = int_to_ptr.vmem [resolvable:$true] %s14_s10 }
   0x3   :  { %p87_p1 = scmp.lt.u32.totalorder %s83_s13, %s187_s0 }
   0x5   :  { %p89_p2 = pnand %p87_p1, %p84_p0 }
   0x7   :  { %92 = shalt.err (!%p89_p2)
}
   0x8   :  { %s93_s18 = scalar_lea.vmem %s15_s10, 256  ;;  %p98_p4 = scmp.lt.s32.totalorder %s15_s10, %s15_s10 }
   0x9   :  { %p94_p3 = scmp.ne.s32.totalorder %s15_s10, %s93_s18  ;;  %p99_p5 = scmp.lt.s32.totalorder %s93_s18, %s93_s18 }
   0xb   :  { %p100_p6 = por %p99_p5, %p98_p4 }
   0xd   :  { %p101_p7 = pnand %p100_p6, %p94_p3 }
   0xf   :  { %104 = shalt.err (!%p101_p7)
}
  0x10   :  { %s132_s19 = smov 128   ;;  %s133_s20 = smov 8  }
  0x11   :  { %20 = dma.hbm_to_vmem [thread:$0]  %s187_s0, 256, %s15_s10, [#allocation3], %s132_s19, %s132_s19, %s133_s20  }
  0x12   :  { %127 = dma.done.wait [#allocation3], 256  }
  0x13   :  { %128 = vsyncadd [#allocation3], 4294967040  ;;  %v26_v0 = vld [vmem:[#allocation2] sm:$0xff]  ;;  %vm30_vm0 = vcmask 261120   ;;  %v27_v1 = vld [vmem:[#allocation2 + $0x8] sm:$0xff]  ;;  %s134_s24 = smov [#allocation5]  }
  0x14   :  { %v28_v2 = vmul.f32 %v26_v0, %v26_v0  ;;  %v29_v3 = vmul.f32 %v27_v1, %v27_v1  ;;  %v74_v13 = vld [vmem:[%s188_s1] ss:$0 sm:$0xff]  ;;  %s62_s25 = sshll.u32 %s134_s24, 4  ;;  %s63_s25 = int_to_ptr.vmem [resolvable:$true] %s62_s25 }
  0x15   :  { %s105_s26 = scalar_lea.vmem %s63_s25, 256  ;;  %p110_p9 = scmp.lt.s32.totalorder %s63_s25, %s63_s25 }
  0x16   :  { %v31_v4 = vsel %vm30_vm0, %v28_v2, 0.0  ;;  %v34_v5 = vsel %vm30_vm0, %v29_v3, 0.0  ;;  %p106_p8 = scmp.ne.s32.totalorder %s63_s25, %s105_s26  ;;  %p111_p10 = scmp.lt.s32.totalorder %s105_s26, %s105_s26 }
  0x17   :  { %32 = vadd.xlane.f32.xlu0 %v31_v4 }
  0x18   :  { %p112_p11 = por %p111_p10, %p110_p9 }
  0x1a   :  { %p113_p12 = pnand %p112_p11, %p106_p8 }
  0x1b   :  { %35 = vadd.xlane.f32.xlu0 %v34_v5 }
  0xa4   :  { %v33_v6 = vpop.xlane.xlu0 %32 }
  0xa5   :  { %v38_v7 = vmul.f32 0.03125, %v33_v6 }
  0xa7   :  { %v40_v8 = vadd.f32 1e-06, %v38_v7 }
  0xa8   :  { %v36_v9 = vpop.xlane.xlu0 %35 }
  0xa9   :  { %79 = vrsqrt.f32 %v40_v8  ;;  %v39_v10 = vmul.f32 0.03125, %v36_v9 }
  0xab   :  { %v41_v11 = vadd.f32 1e-06, %v39_v10 }
  0xad   :  { %81 = vrsqrt.f32 %v41_v11 }
  0xb3   :  { %v80_v12 = vpop.eup %79 }
  0xb4   :  { %v44_v14 = vmul.f32 %v80_v12, %v26_v0 }
  0xb6   :  { %v53_v15 = vmul.f32 %v74_v13, %v44_v14 }
  0xb7   :  { %v82_v16 = vpop.eup %81 }
  0xb8   :  { %v45_v17 = vmul.f32 %v82_v16, %v27_v1  ;;  %55 = vst.msk [vmem:[#allocation5] sm:$0xff] %vm30_vm0, %v53_v15 }
  0xba   :  { %v54_v18 = vmul.f32 %v74_v13, %v45_v17 }
  0xbc   :  { %56 = vst.msk [vmem:[#allocation5 + $0x8] sm:$0xff] %vm30_vm0, %v54_v18 }
  0xbd   :  { %116 = shalt.err (!%p113_p12)
}
  0xbe   :  { %s117_s28 = scalar_lea.hbm %s189_s2, 256 }
  0xbf   :  { %p118_p13 = scmp.ne.s32.totalorder %s189_s2, %s117_s28  ;;  %p121_p0 = scmp.lt.u32.totalorder %s117_s28, %s189_s2 }
  0xc1   :  { %p123_p1 = pnand %p121_p0, %p118_p13 }
  0xc3   :  { %126 = shalt.err (!%p123_p1)
}
  0xc4   :  { %68 = dma.vmem_to_hbm [thread:$0]  %s63_s25, 256, %s189_s2, [#allocation4], %s132_s19, %s132_s19, %s133_s20  }
  0xc5   :  { %129 = dma.done.wait [#allocation4], 256  }
  0xc6   :  { %130 = vsyncadd [#allocation4], 4294967040 }
  0xc7   :  { %72 = vsyncpa [#allocation3], 1 }
  0xc8   :  { %73 = vsyncpa [#allocation4], 1 }

</bundles_post_ra>
